<compile_context>
chip_gen: v7x
topology: tpu7x:2x2x1
jax: 0.10.0
libtpu: 0.0.40
codegen_flags: <defaults>
</compile_context>

<pallas_src>
import functools

import jax
import jax.numpy as jnp
from jax.experimental import pallas as pl
from jax.experimental.pallas import tpu as pltpu

_SUBLANE = 8          # vreg sublane count
_MAX_BATCH_TILE = 1024  # sweet spot per measured tiled-add roofline data
                        # (double-buffered footprint at tb=1024 is ~1 MiB,
                        #  nowhere near any generation's scoped VMEM limit).


def _round_up(x, m):
    return ((x + m - 1) // m) * m


def _pick_batch_tile(batch):
    """Batch tile: multiple of 8 sublanes; single tile for small batches,
    even/balanced tile count for large batches (v7x 2-TC load balance)."""
    if batch <= _MAX_BATCH_TILE:
        return _round_up(batch, _SUBLANE)
    pairs = -(-batch // (2 * _MAX_BATCH_TILE))           # ceil
    return _round_up(-(-batch // (2 * pairs)), _SUBLANE)  # even #tiles, ~equal size


def _recognition_kernel(p_ref, c_ref, r_ref, wmu_ref, wlv_ref, bmu_ref, blv_ref,
                        mu_ref, lv_ref):
    # p/c/r : (tb, E) activation tiles (only useful bytes DMA'd from HBM)
    # wmu/wlv : (3, E, z) resident weight slabs (index_map -> constant block)
    # bmu/blv : (1, z) resident biases
    # mu/lv : (tb, z) narrow outputs
    p = p_ref[...]
    c = c_ref[...]
    r = r_ref[...]

    mu_acc = jnp.dot(p, wmu_ref[0], preferred_element_type=jnp.float32)
    mu_acc = mu_acc + jnp.dot(c, wmu_ref[1], preferred_element_type=jnp.float32)
    mu_acc = mu_acc + jnp.dot(r, wmu_ref[2], preferred_element_type=jnp.float32)

    lv_acc = jnp.dot(p, wlv_ref[0], preferred_element_type=jnp.float32)
    lv_acc = lv_acc + jnp.dot(c, wlv_ref[1], preferred_element_type=jnp.float32)
    lv_acc = lv_acc + jnp.dot(r, wlv_ref[2], preferred_element_type=jnp.float32)

    mu_ref[...] = (mu_acc + bmu_ref[...]).astype(mu_ref.dtype)
    lv_ref[...] = (lv_acc + blv_ref[...]).astype(lv_ref.dtype)


def prepare_recognition_params(weight, bias, z_dim, *, param_dtype=None):
    """One-time parameter preprocessing (run at init, NOT per forward call).

    weight: (2*z_dim, 3*embed_dim)  -- PyTorch nn.Linear layout
    bias:   (2*z_dim,)
    param_dtype: optionally bf16 on v6e/v7x to halve weight read bytes
                 (keep it equal to the activation dtype to avoid in-kernel casts).
    Returns (w_mu, w_lv, b_mu, b_lv) with shapes
      (3, E, z_dim), (3, E, z_dim), (1, z_dim), (1, z_dim).
    """
    out_dim = 2 * z_dim
    assert weight.shape[0] == out_dim
    in_dim = weight.shape[1]
    assert in_dim % 3 == 0
    embed_dim = in_dim // 3

    w_t = weight.T  # (3E, 2z): x @ W.T == sum_k  x_k @ w_t[kE:(k+1)E]
    if param_dtype is not None:
        w_t = w_t.astype(param_dtype)
        bias = bias.astype(param_dtype)
    w_mu = w_t[:, :z_dim].reshape(3, embed_dim, z_dim)
    w_lv = w_t[:, z_dim:].reshape(3, embed_dim, z_dim)
    b_mu = bias[:z_dim].reshape(1, z_dim)
    b_lv = bias[z_dim:].reshape(1, z_dim)
    return w_mu, w_lv, b_mu, b_lv


@jax.jit
def recognition_forward(persona, context, response, w_mu, w_lv, b_mu, b_lv):
    """persona/context/response: (B, E); params from prepare_recognition_params.
    Returns (mu, logvar), each (B, z_dim).  Semantics:
      h = cat([p, c, r], dim=1) @ W.T + b ; mu, logvar = split(h, z_dim)."""
    batch, embed_dim = persona.shape
    z_dim = w_mu.shape[-1]

    tb = _pick_batch_tile(batch)
    grid = (pl.cdiv(batch, tb),)  # ragged final tile handled by Pallas masking

    mu, logvar = pl.pallas_call(
        _recognition_kernel,
        out_shape=(
            jax.ShapeDtypeStruct((batch, z_dim), persona.dtype),
            jax.ShapeDtypeStruct((batch, z_dim), persona.dtype),
        ),
        grid=grid,
        in_specs=[
            pl.BlockSpec((tb, embed_dim), lambda i: (i, 0)),        # persona
            pl.BlockSpec((tb, embed_dim), lambda i: (i, 0)),        # context
            pl.BlockSpec((tb, embed_dim), lambda i: (i, 0)),        # response
            pl.BlockSpec((3, embed_dim, z_dim), lambda i: (0, 0, 0)),  # w_mu (resident)
            pl.BlockSpec((3, embed_dim, z_dim), lambda i: (0, 0, 0)),  # w_lv (resident)
            pl.BlockSpec((1, z_dim), lambda i: (0, 0)),             # b_mu (resident)
            pl.BlockSpec((1, z_dim), lambda i: (0, 0)),             # b_lv (resident)
        ],
        out_specs=(
            pl.BlockSpec((tb, z_dim), lambda i: (i, 0)),
            pl.BlockSpec((tb, z_dim), lambda i: (i, 0)),
        ),
        compiler_params=pltpu.CompilerParams(
            dimension_semantics=("parallel",)),  # shard batch tiles across TCs (v7x)
    )(persona, context, response, w_mu, w_lv, b_mu, b_lv)

    return mu, logvar


if __name__ == "__main__":
    batch = 2
    embed_dim = 32
    z_dim = 16

    key = jax.random.PRNGKey(0)
    kp, kc, kr, kw, kb = jax.random.split(key, 5)

    persona = jax.random.normal(kp, (batch, embed_dim), dtype=jnp.float32)
    context = jax.random.normal(kc, (batch, embed_dim), dtype=jnp.float32)
    response = jax.random.normal(kr, (batch, embed_dim), dtype=jnp.float32)

    # Deterministic "nn.Linear(embed_dim*3, z_dim*2)" parameters (PyTorch layout).
    weight = jax.random.normal(kw, (2 * z_dim, 3 * embed_dim), dtype=jnp.float32) * 0.05
    bias = jax.random.normal(kb, (2 * z_dim,), dtype=jnp.float32) * 0.05

    # One-time parameter preprocessing, outside the per-call hot path.
    params = jax.block_until_ready(
        prepare_recognition_params(weight, bias, z_dim))

    mu, logvar = recognition_forward(persona, context, response, *params)
    jax.block_until_ready((mu, logvar))

    # Reference check against plain JAX (same semantics as the PyTorch module).
    h = jnp.concatenate([persona, context, response], axis=1) @ weight.T + bias
    mu_ref, logvar_ref = h[:, :z_dim], h[:, z_dim:]
    assert mu.shape == (batch, z_dim) and logvar.shape == (batch, z_dim)
    assert jnp.allclose(mu, mu_ref, atol=1e-5) and jnp.allclose(logvar, logvar_ref, atol=1e-5)

    print("KERNEL_OK")
</pallas_src>

<mosaic_0001>
module attributes {stable_mosaic.version = 11 : i64} {
  func.func @_recognition_kernel(%arg0: i32, %arg1: memref<8x32xf32, #tpu.memory_space<vmem>>, %arg2: memref<8x32xf32, #tpu.memory_space<vmem>>, %arg3: memref<8x32xf32, #tpu.memory_space<vmem>>, %arg4: memref<3x32x16xf32, #tpu.memory_space<vmem>>, %arg5: memref<3x32x16xf32, #tpu.memory_space<vmem>>, %arg6: memref<1x16xf32, #tpu.memory_space<vmem>>, %arg7: memref<1x16xf32, #tpu.memory_space<vmem>>, %arg8: memref<8x16xf32, #tpu.memory_space<vmem>>, %arg9: memref<8x16xf32, #tpu.memory_space<vmem>>) attributes {dimension_semantics = [#tpu.dimension_semantics<parallel>], iteration_bounds = array<i64: 1>, scalar_prefetch = 0 : i64, scratch_operands = 0 : i64, tpu.core_type = #tpu.core_type<tc>, window_params = [{transform_indices = @transform_0, window_bounds = array<i64: 8, 32>}, {transform_indices = @transform_1, window_bounds = array<i64: 8, 32>}, {transform_indices = @transform_2, window_bounds = array<i64: 8, 32>}, {pipeline_mode = #tpu.pipeline_mode<synchronous>, transform_indices = @transform_3, window_bounds = array<i64: 3, 32, 16>}, {pipeline_mode = #tpu.pipeline_mode<synchronous>, transform_indices = @transform_4, window_bounds = array<i64: 3, 32, 16>}, {pipeline_mode = #tpu.pipeline_mode<synchronous>, transform_indices = @transform_5, window_bounds = array<i64: 1, 16>}, {pipeline_mode = #tpu.pipeline_mode<synchronous>, transform_indices = @transform_6, window_bounds = array<i64: 1, 16>}, {transform_indices = @transform_7, window_bounds = array<i64: 8, 16>}, {transform_indices = @transform_8, window_bounds = array<i64: 8, 16>}]} {
    %c0 = arith.constant 0 : index
    %c0_0 = arith.constant 0 : index
    %0 = vector.load %arg1[%c0, %c0_0] : memref<8x32xf32, #tpu.memory_space<vmem>>, vector<8x32xf32>
    %c0_1 = arith.constant 0 : index
    %c0_2 = arith.constant 0 : index
    %1 = vector.load %arg2[%c0_1, %c0_2] : memref<8x32xf32, #tpu.memory_space<vmem>>, vector<8x32xf32>
    %c0_3 = arith.constant 0 : index
    %c0_4 = arith.constant 0 : index
    %2 = vector.load %arg3[%c0_3, %c0_4] : memref<8x32xf32, #tpu.memory_space<vmem>>, vector<8x32xf32>
    %c0_5 = arith.constant 0 : index
    %c0_6 = arith.constant 0 : index
    %c0_7 = arith.constant 0 : index
    %3 = vector.load %arg4[%c0_5, %c0_6, %c0_7] : memref<3x32x16xf32, #tpu.memory_space<vmem>>, vector<1x32x16xf32>
    %4 = vector.shape_cast %3 : vector<1x32x16xf32> to vector<32x16xf32>
    %cst = arith.constant dense<0.000000e+00> : vector<8x16xf32>
    %5 = tpu.matmul %0, %4, %cst {dimension_numbers = #tpu.dot_dimension_numbers<[1], [0], [0], [1], [0, 0, 1, 1], [], []>} : vector<8x32xf32>, vector<32x16xf32>, vector<8x16xf32> -> vector<8x16xf32>
    %c1 = arith.constant 1 : index
    %c0_8 = arith.constant 0 : index
    %c0_9 = arith.constant 0 : index
    %6 = vector.load %arg4[%c1, %c0_8, %c0_9] : memref<3x32x16xf32, #tpu.memory_space<vmem>>, vector<1x32x16xf32>
    %7 = vector.shape_cast %6 : vector<1x32x16xf32> to vector<32x16xf32>
    %cst_10 = arith.constant dense<0.000000e+00> : vector<8x16xf32>
    %8 = tpu.matmul %1, %7, %cst_10 {dimension_numbers = #tpu.dot_dimension_numbers<[1], [0], [0], [1], [0, 0, 1, 1], [], []>} : vector<8x32xf32>, vector<32x16xf32>, vector<8x16xf32> -> vector<8x16xf32>
    %9 = arith.addf %5, %8 : vector<8x16xf32>
    %c2 = arith.constant 2 : index
    %c0_11 = arith.constant 0 : index
    %c0_12 = arith.constant 0 : index
    %10 = vector.load %arg4[%c2, %c0_11, %c0_12] : memref<3x32x16xf32, #tpu.memory_space<vmem>>, vector<1x32x16xf32>
    %11 = vector.shape_cast %10 : vector<1x32x16xf32> to vector<32x16xf32>
    %cst_13 = arith.constant dense<0.000000e+00> : vector<8x16xf32>
    %12 = tpu.matmul %2, %11, %cst_13 {dimension_numbers = #tpu.dot_dimension_numbers<[1], [0], [0], [1], [0, 0, 1, 1], [], []>} : vector<8x32xf32>, vector<32x16xf32>, vector<8x16xf32> -> vector<8x16xf32>
    %13 = arith.addf %9, %12 : vector<8x16xf32>
    %c0_14 = arith.constant 0 : index
    %c0_15 = arith.constant 0 : index
    %c0_16 = arith.constant 0 : index
    %14 = vector.load %arg5[%c0_14, %c0_15, %c0_16] : memref<3x32x16xf32, #tpu.memory_space<vmem>>, vector<1x32x16xf32>
    %15 = vector.shape_cast %14 : vector<1x32x16xf32> to vector<32x16xf32>
    %cst_17 = arith.constant dense<0.000000e+00> : vector<8x16xf32>
    %16 = tpu.matmul %0, %15, %cst_17 {dimension_numbers = #tpu.dot_dimension_numbers<[1], [0], [0], [1], [0, 0, 1, 1], [], []>} : vector<8x32xf32>, vector<32x16xf32>, vector<8x16xf32> -> vector<8x16xf32>
    %c1_18 = arith.constant 1 : index
    %c0_19 = arith.constant 0 : index
    %c0_20 = arith.constant 0 : index
    %17 = vector.load %arg5[%c1_18, %c0_19, %c0_20] : memref<3x32x16xf32, #tpu.memory_space<vmem>>, vector<1x32x16xf32>
    %18 = vector.shape_cast %17 : vector<1x32x16xf32> to vector<32x16xf32>
    %cst_21 = arith.constant dense<0.000000e+00> : vector<8x16xf32>
    %19 = tpu.matmul %1, %18, %cst_21 {dimension_numbers = #tpu.dot_dimension_numbers<[1], [0], [0], [1], [0, 0, 1, 1], [], []>} : vector<8x32xf32>, vector<32x16xf32>, vector<8x16xf32> -> vector<8x16xf32>
    %20 = arith.addf %16, %19 : vector<8x16xf32>
    %c2_22 = arith.constant 2 : index
    %c0_23 = arith.constant 0 : index
    %c0_24 = arith.constant 0 : index
    %21 = vector.load %arg5[%c2_22, %c0_23, %c0_24] : memref<3x32x16xf32, #tpu.memory_space<vmem>>, vector<1x32x16xf32>
    %22 = vector.shape_cast %21 : vector<1x32x16xf32> to vector<32x16xf32>
    %cst_25 = arith.constant dense<0.000000e+00> : vector<8x16xf32>
    %23 = tpu.matmul %2, %22, %cst_25 {dimension_numbers = #tpu.dot_dimension_numbers<[1], [0], [0], [1], [0, 0, 1, 1], [], []>} : vector<8x32xf32>, vector<32x16xf32>, vector<8x16xf32> -> vector<8x16xf32>
    %24 = arith.addf %20, %23 : vector<8x16xf32>
    %c0_26 = arith.constant 0 : index
    %c0_27 = arith.constant 0 : index
    %25 = vector.load %arg6[%c0_26, %c0_27] : memref<1x16xf32, #tpu.memory_space<vmem>>, vector<1x16xf32>
    %26 = vector.broadcast %25 : vector<1x16xf32> to vector<8x16xf32>
    %27 = arith.addf %13, %26 : vector<8x16xf32>
    %c0_28 = arith.constant 0 : index
    %c0_29 = arith.constant 0 : index
    %28 = vector.load %arg8[%c0_28, %c0_29] : memref<8x16xf32, #tpu.memory_space<vmem>>, vector<8x16xf32>
    tpu.vector_store %arg8[%c0_28, %c0_29], %27 {strides = array<i32>} : memref<8x16xf32, #tpu.memory_space<vmem>>, vector<8x16xf32>,
    %c0_30 = arith.constant 0 : index
    %c0_31 = arith.constant 0 : index
    %29 = vector.load %arg7[%c0_30, %c0_31] : memref<1x16xf32, #tpu.memory_space<vmem>>, vector<1x16xf32>
    %30 = vector.broadcast %29 : vector<1x16xf32> to vector<8x16xf32>
    %31 = arith.addf %24, %30 : vector<8x16xf32>
    %c0_32 = arith.constant 0 : index
    %c0_33 = arith.constant 0 : index
    %32 = vector.load %arg9[%c0_32, %c0_33] : memref<8x16xf32, #tpu.memory_space<vmem>>, vector<8x16xf32>
    tpu.vector_store %arg9[%c0_32, %c0_33], %31 {strides = array<i32>} : memref<8x16xf32, #tpu.memory_space<vmem>>, vector<8x16xf32>,
    return
  }
  func.func @transform_0(%arg0: i32) -> (i32, i32) {
    %c0_i32 = arith.constant 0 : i32
    %c0_i32_0 = arith.constant 0 : i32
    return %arg0, %c0_i32 : i32, i32
  }
  func.func @transform_1(%arg0: i32) -> (i32, i32) {
    %c0_i32 = arith.constant 0 : i32
    %c0_i32_0 = arith.constant 0 : i32
    return %arg0, %c0_i32 : i32, i32
  }
  func.func @transform_2(%arg0: i32) -> (i32, i32) {
    %c0_i32 = arith.constant 0 : i32
    %c0_i32_0 = arith.constant 0 : i32
    return %arg0, %c0_i32 : i32, i32
  }
  func.func @transform_3(%arg0: i32) -> (i32, i32, i32) {
    %c0_i32 = arith.constant 0 : i32
    %c0_i32_0 = arith.constant 0 : i32
    %c0_i32_1 = arith.constant 0 : i32
    %c0_i32_2 = arith.constant 0 : i32
    return %c0_i32, %c0_i32_0, %c0_i32_1 : i32, i32, i32
  }
  func.func @transform_4(%arg0: i32) -> (i32, i32, i32) {
    %c0_i32 = arith.constant 0 : i32
    %c0_i32_0 = arith.constant 0 : i32
    %c0_i32_1 = arith.constant 0 : i32
    %c0_i32_2 = arith.constant 0 : i32
    return %c0_i32, %c0_i32_0, %c0_i32_1 : i32, i32, i32
  }
  func.func @transform_5(%arg0: i32) -> (i32, i32) {
    %c0_i32 = arith.constant 0 : i32
    %c0_i32_0 = arith.constant 0 : i32
    %c0_i32_1 = arith.constant 0 : i32
    return %c0_i32, %c0_i32_0 : i32, i32
  }
  func.func @transform_6(%arg0: i32) -> (i32, i32) {
    %c0_i32 = arith.constant 0 : i32
    %c0_i32_0 = arith.constant 0 : i32
    %c0_i32_1 = arith.constant 0 : i32
    return %c0_i32, %c0_i32_0 : i32, i32
  }
  func.func @transform_7(%arg0: i32) -> (i32, i32) {
    %c0_i32 = arith.constant 0 : i32
    %c0_i32_0 = arith.constant 0 : i32
    return %arg0, %c0_i32 : i32, i32
  }
  func.func @transform_8(%arg0: i32) -> (i32, i32) {
    %c0_i32 = arith.constant 0 : i32
    %c0_i32_0 = arith.constant 0 : i32
    return %arg0, %c0_i32 : i32, i32
  }
}

</mosaic_0001>

<bundles_post_ra>
// kernel: recognition_forward.1
= control target key start
LH: loop header
LB: loop body
LE: loop exit
PB: predicated region body
PF: predicated region fallthrough
CT: control target
= control target key end

     0   :  { %14 = vsyncpa [#allocation3], 0  ;;  %s942_s0 = inlined_call_operand.vmem [shape: f32[2,32], index: 0, kind: input, shape index: {}]   ;;  %s943_s1 = inlined_call_operand.vmem [shape: f32[2,32], index: 1, kind: input, shape index: {}]   ;;  %s944_s2 = inlined_call_operand.vmem [shape: f32[2,32], index: 2, kind: input, shape index: {}]   ;;  %s945_s3 = inlined_call_operand.vmem [shape: f32[3,32,16], index: 3, kind: input, shape index: {}]   ;;  %s946_s4 = inlined_call_operand.vmem [shape: f32[3,32,16], index: 4, kind: input, shape index: {}]   ;;  %s947_s5 = inlined_call_operand.vmem [shape: f32[1,16], index: 5, kind: input, shape index: {}]   ;;  %s948_s6 = inlined_call_operand.vmem [shape: f32[1,16], index: 6, kind: input, shape index: {}]   ;;  %s949_s7 = inlined_call_operand.hbm [shape: f32[2,16], index: 7, kind: output, shape index: {0}]   ;;  %s950_s8 = inlined_call_operand.hbm [shape: f32[2,16], index: 8, kind: output, shape index: {1}]  }
   0x1   :  { %15 = vsyncpa [#allocation5], 0  ;;  %v544_v0 = vld [vmem:[%s945_s3 + $0x20] sm:$0xff]  ;;  %v545_v1 = vld [vmem:[%s945_s3 + $0x28] sm:$0xff]  ;;  %v755_v2 = vmov 0.0|0.0   ;;  %vm756_vm0 = vmmov 0  }
   0x2   :  { %664 = vmatprep.subr.bf16.mxu0 %v755_v2  ;;  %v665_v3 = vpack.c.bf16 %v545_v1, %v544_v0  ;;  %670 = vmatprep.subr.bf16.mxu1 %v755_v2  ;;  %v33_v4 = vld [vmem:[%s945_s3] sm:$0xff]  ;;  %v34_v5 = vld [vmem:[%s945_s3 + $0x8] sm:$0xff]  ;;  %v546_v6 = vld [vmem:[%s945_s3 + $0x30] sm:$0xff]  ;;  %v757_v11 = vmov 0.0   ;;  %vm42_vm1 = vcmask 261120   ;;  %vm501_vm2 = vcmask 130048  }
   0x3   :  { %v671_v7 = vpack.c.bf16 %v34_v5, %v33_v4  ;;  %v547_v8 = vld [vmem:[%s945_s3 + $0x38] sm:$0xff]  ;;  %v35_v9 = vld [vmem:[%s945_s3 + $0x10] sm:$0xff]  ;;  %606 = vmatprep.mubr.msk.f32.mxu0 %vm756_vm0, %v757_v11  ;;  %617 = vmatprep.mubr.msk.f32.mxu1 %vm756_vm0, %v757_v11  ;;  %v550_v14 = vld [vmem:[%s945_s3 + $0x40] sm:$0xff] }
   0x4   :  { %v36_v10 = vld [vmem:[%s945_s3 + $0x18] sm:$0xff]  ;;  %666 = vmatpush3.bf16.msra.mxu0 %v665_v3  ;;  %v668_v12 = vpack.c.bf16 %v547_v8, %v546_v6  ;;  %v551_v15 = vld [vmem:[%s945_s3 + $0x48] sm:$0xff]  ;;  %v555_v16 = vld [vmem:[%s946_s4 + $0x20] sm:$0xff] }
   0x5   :  { %672 = vmatpush3.bf16.msra.mxu1 %v671_v7  ;;  %667 = vmatprep.subr.bf16.mxu0 %v755_v2  ;;  %v674_v13 = vpack.c.bf16 %v36_v10, %v35_v9  ;;  %v556_v17 = vld [vmem:[%s946_s4 + $0x28] sm:$0xff]  ;;  %v31_v18 = vld [vmem:[%s943_s1] sm:$0xff]  ;;  %v677_v19 = vpack.c.bf16 %v551_v15, %v550_v14  ;;  %v552_v22 = vld [vmem:[%s945_s3 + $0x50] sm:$0xff] }
   0x6   :  { %673 = vmatprep.subr.bf16.mxu1 %v755_v2  ;;  %v30_v20 = vld [vmem:[%s942_s0] sm:$0xff]  ;;  %v683_v21 = vpack.c.bf16 %v556_v17, %v555_v16  ;;  %v553_v23 = vld [vmem:[%s945_s3 + $0x58] sm:$0xff]  ;;  %v557_v24 = vld [vmem:[%s946_s4 + $0x30] sm:$0xff] }
   0x7   :  { %v558_v25 = vld [vmem:[%s946_s4 + $0x38] sm:$0xff]  ;;  %v680_v26 = vpack.c.bf16 %v553_v23, %v552_v22  ;;  %v268_v28 = vld [vmem:[%s946_s4] sm:$0xff]  ;;  %v269_v29 = vld [vmem:[%s946_s4 + $0x8] sm:$0xff] }
   0x8   :  { %669 = vmatpush3.bf16.msra.mxu0 %v668_v12  ;;  %v686_v27 = vpack.c.bf16 %v558_v25, %v557_v24  ;;  %v561_v30 = vld [vmem:[%s946_s4 + $0x40] sm:$0xff]  ;;  %v562_v31 = vld [vmem:[%s946_s4 + $0x48] sm:$0xff]  ;;  %v689_v33 = vpack.c.bf16 %v269_v29, %v268_v28  ;;  %v270_v35 = vld [vmem:[%s946_s4 + $0x10] sm:$0xff] }
   0x9   :  { %675 = vmatpush3.bf16.msra.mxu1 %v674_v13  ;;  %676 = vmatprep.subr.bf16.mxu0 %v755_v2  ;;  %v32_v32 = vld [vmem:[%s944_s2] sm:$0xff]  ;;  %v695_v34 = vpack.c.bf16 %v562_v31, %v561_v30  ;;  %v271_v36 = vld [vmem:[%s946_s4 + $0x18] sm:$0xff]  ;;  %v563_v37 = vld [vmem:[%s946_s4 + $0x50] sm:$0xff] }
   0xa   :  { %682 = vmatprep.subr.bf16.mxu1 %v755_v2  ;;  %v564_v38 = vld [vmem:[%s946_s4 + $0x58] sm:$0xff]  ;;  %v692_v39 = vpack.c.bf16 %v271_v36, %v270_v35  ;;  %v566_v47 = vld [vmem:[%s947_s5] ss:$0 sm:$0xff] }
   0xb   :  { %607 = vmatmul.mubr.msk.f32.vlgmr.msra.gmra.mrb[0].mxu0 %vm42_vm1, %v31_v18  ;;  %v698_v40 = vpack.c.bf16 %v564_v38, %v563_v37  ;;  %v567_v57 = vld [vmem:[%s948_s6] ss:$0 sm:$0xff] }
   0xc   :  { %618 = vmatmul.mubr.msk.f32.vlgmr.msra.gmra.mrb[0].mxu1 %vm42_vm1, %v30_v20  ;;  %678 = vmatpush3.bf16.msra.mxu0 %v677_v19 }
   0xd   :  { %684 = vmatpush3.bf16.msra.mxu1 %v683_v21  ;;  %679 = vmatprep.subr.bf16.mxu0 %v755_v2 }
   0xe   :  { %685 = vmatprep.subr.bf16.mxu1 %v755_v2  ;;  %628 = vmatprep.mubr.msk.f32.mxu0 %vm756_vm0, %v757_v11 }
   0xf   :  { %639 = vmatprep.mubr.msk.f32.mxu1 %vm756_vm0, %v757_v11 }
  0x10   :  { %681 = vmatpush3.bf16.msra.mxu0 %v680_v26 }
  0x11   :  { %687 = vmatpush3.bf16.msra.mxu1 %v686_v27  ;;  %688 = vmatprep.subr.bf16.mxu0 %v755_v2 }
  0x12   :  { %694 = vmatprep.subr.bf16.mxu1 %v755_v2 }
  0x13   :  { %629 = vmatmul.mubr.msk.f32.vlgmr.msra.gmra.mrb[2].mxu0 %vm42_vm1, %v32_v32 }
  0x14   :  { %690 = vmatpush3.bf16.msra.mxu0 %v689_v33  ;;  %640 = vmatmul.mubr.msk.f32.vlgmr.msra.gmra.mrb[2].mxu1 %vm42_vm1, %v31_v18 }
  0x15   :  { %696 = vmatpush3.bf16.msra.mxu1 %v695_v34  ;;  %691 = vmatprep.subr.bf16.mxu0 %v755_v2 }
  0x16   :  { %697 = vmatprep.subr.bf16.mxu1 %v755_v2  ;;  %650 = vmatprep.mubr.msk.f32.mxu0 %vm756_vm0, %v757_v11 }
  0x17   :  { %661 = vmatprep.mubr.msk.f32.mxu1 %vm756_vm0, %v757_v11 }
  0x18   :  { %693 = vmatpush3.bf16.msra.mxu0 %v692_v39 }
  0x19   :  { %699 = vmatpush3.bf16.msra.mxu1 %v698_v40 }
  0x1b   :  { %651 = vmatmul.mubr.msk.f32.vlgmr.msra.gmra.mrb[4].mxu0 %vm42_vm1, %v30_v20 }
  0x1c   :  { %662 = vmatmul.mubr.msk.f32.vlgmr.msra.gmra.mrb[4].mxu1 %vm42_vm1, %v32_v32 }
  0xde   :  { %v112_v41 = vpop.f32.mrb[0].mxu0 }
  0xdf   :  { %v608_v42 = vpop.f32.mrb[1].mxu0  ;;  %v185_v43 = vpop.f32.mrb[0].mxu1 }
  0xe0   :  { %v186_v44 = vadd.f32 %v185_v43, %v112_v41  ;;  %v619_v45 = vpop.f32.mrb[1].mxu1 }
  0xe6   :  { %v263_v46 = vpop.f32.mrb[2].mxu0 }
  0xe7   :  { %v267_v48 = vadd.f32 %v263_v46, %v186_v44  ;;  %v630_v49 = vpop.f32.mrb[3].mxu0  ;;  %v343_v50 = vpop.f32.mrb[2].mxu1 }
  0xe8   :  { %v641_v51 = vpop.f32.mrb[3].mxu1 }
  0xe9   :  { %v500_v52 = vadd.f32 %v566_v47, %v267_v48 }
  0xeb   :  { %502 = vst.msk [vmem:[#allocation2] sm:$0xff] %vm501_vm2, %v500_v52 }
  0xee   :  { %v413_v53 = vpop.f32.mrb[4].mxu0 }
  0xef   :  { %v414_v54 = vadd.f32 %v413_v53, %v343_v50  ;;  %v652_v55 = vpop.f32.mrb[5].mxu0  ;;  %v488_v56 = vpop.f32.mrb[4].mxu1 }
  0xf0   :  { %v663_v58 = vpop.f32.mrb[5].mxu1 }
  0xf1   :  { %v492_v59 = vadd.f32 %v488_v56, %v414_v54 }
  0xf3   :  { %v510_v60 = vadd.f32 %v567_v57, %v492_v59 }
  0xf5   :  { %511 = vst.msk [vmem:[#allocation4] sm:$0xff] %vm501_vm2, %v510_v60 }
  0xf6   :  { %516 = vsyncadd [#allocation3], 96  ;;  %s758_s5 = smov [#allocation2]  }
  0xf7   :  { %s517_s14 = sshll.u32 %s758_s5, 4  ;;  %s518_s14 = int_to_ptr.vmem [resolvable:$true] %s517_s14 }
  0xf8   :  { %s707_s1 = scalar_lea.vmem %s518_s14, 32  ;;  %s711_s15 = scalar_lea.vmem %s518_s14, 128 }
  0xf9   :  { %p708_p0 = scmp.ne.s32.totalorder %s518_s14, %s707_s1  ;;  %p712_p1 = scmp.lt.s32.totalorder %s518_s14, %s518_s14 }
  0xfa   :  { %p713_p2 = scmp.lt.s32.totalorder %s711_s15, %s707_s1 }
  0xfc   :  { %p714_p3 = por %p713_p2, %p712_p1 }
  0xfe   :  { %p715_p4 = pnand %p714_p3, %p708_p0 }
 0x100   :  { %718 = shalt.err (!%p715_p4)
}
 0x101   :  { %s719_s6 = scalar_lea.hbm %s949_s7, 32 }
 0x102   :  { %p720_p5 = scmp.ne.s32.totalorder %s949_s7, %s719_s6  ;;  %p723_p6 = scmp.lt.u32.totalorder %s719_s6, %s949_s7 }
 0x104   :  { %p725_p7 = pnand %p723_p6, %p720_p5 }
 0x106   :  { %728 = shalt.err (!%p725_p7)
}
 0x107   :  { %s759_s20 = smov 32   ;;  %s760_s21 = smov 2  }
 0x108   :  { %523 = dma.vmem_to_hbm [thread:$0]  %s518_s14, 32, %s949_s7, [#allocation3], %s759_s20, %s759_s20, %s760_s21  }
 0x109   :  { %528 = vsyncadd [#allocation5], 96  ;;  %s761_s24 = smov [#allocation4]  }
 0x10a   :  { %s529_s25 = sshll.u32 %s761_s24, 4  ;;  %s530_s25 = int_to_ptr.vmem [resolvable:$true] %s529_s25 }
 0x10b   :  { %s729_s26 = scalar_lea.vmem %s530_s25, 32  ;;  %s733_s27 = scalar_lea.vmem %s530_s25, 128 }
 0x10c   :  { %p730_p8 = scmp.ne.s32.totalorder %s530_s25, %s729_s26  ;;  %p734_p9 = scmp.lt.s32.totalorder %s530_s25, %s530_s25 }
 0x10d   :  { %p735_p10 = scmp.lt.s32.totalorder %s733_s27, %s729_s26 }
 0x10f   :  { %p736_p11 = por %p735_p10, %p734_p9 }
 0x111   :  { %p737_p12 = pnand %p736_p11, %p730_p8 }
 0x113   :  { %740 = shalt.err (!%p737_p12)
}
 0x114   :  { %s741_s30 = scalar_lea.hbm %s950_s8, 32 }
 0x115   :  { %p742_p13 = scmp.ne.s32.totalorder %s950_s8, %s741_s30  ;;  %p745_p0 = scmp.lt.u32.totalorder %s741_s30, %s950_s8 }
 0x117   :  { %p747_p1 = pnand %p745_p0, %p742_p13 }
 0x119   :  { %750 = shalt.err (!%p747_p1)
}
 0x11a   :  { %535 = dma.vmem_to_hbm [thread:$0]  %s530_s25, 32, %s950_s8, [#allocation5], %s759_s20, %s759_s20, %s760_s21  }
 0x11b   :  { %751 = dma.done.wait [#allocation3], 128  }
 0x11c   :  { %752 = vsyncadd [#allocation3], 4294967168 }
 0x11d   :  { %753 = dma.done.wait [#allocation5], 128  }
 0x11e   :  { %754 = vsyncadd [#allocation5], 4294967168 }
 0x11f   :  { %542 = vsyncpa [#allocation3], 1 }
 0x120   :  { %543 = vsyncpa [#allocation5], 1 }

</bundles_post_ra>
